<compile_context>
chip_gen: v6e
topology: v6e:2x2x1
jax: 0.10.0
libtpu: 0.0.40
codegen_flags: <defaults>
</compile_context>

<pallas_src>
import functools

import jax
import jax.numpy as jnp
from jax import lax
from jax.experimental import pallas as pl
from jax.experimental.pallas import tpu as pltpu

BN_EPS = 1e-5


def _tpu_vmem_bytes():
    try:
        return int(pltpu.get_tpu_info().vmem_capacity_bytes)
    except Exception:
        return 64 * 1024 * 1024  # conservative fallback (v7x per-TC VMEM)


_PHYS_VMEM = _tpu_vmem_bytes()
VMEM_LIMIT = max(32 * 1024 * 1024, (_PHYS_VMEM * 3) // 4)   # ~48 MiB v7x, ~96 MiB v5e/v6e
MAX_TILE_M = 1024 if _PHYS_VMEM >= (128 << 20) else 512


def _compiler_params(semantics):
    return pltpu.CompilerParams(dimension_semantics=semantics,
                                vmem_limit_bytes=VMEM_LIMIT)


def _pick_tile_m(m, bytes_per_row, fixed_bytes=0):
    """Largest M tile that fits half the scoped-VMEM budget (double-buffered)."""
    budget = max(VMEM_LIMIT // 2 - fixed_bytes, 0)
    tm = budget // max(bytes_per_row, 1)
    tm = min(MAX_TILE_M, tm)
    tm = max(8, (tm // 8) * 8)
    return m if m <= tm else tm


def _lane_fold(m, c):
    """Fold factor k so the elementwise kernels see a 128-lane-dense last dim."""
    if c >= 128 or (128 % c) != 0:
        return 1
    k = 128 // c
    return k if (m % k) == 0 else 1


# -------------------- Pallas kernels --------------------

def _conv1_shortcut_stats_kernel(p_ref, w1_ref, we_ref, b1_ref, be_ref,
                                 y1_ref, ye_ref,
                                 s1_ref, q1_ref, se_ref, qe_ref,
                                 *, m_valid, cin, center_col):
    """One M-tile of: y1 = patches @ w1 + b1 (full 3x3) and ye = center-tap
    slice of the SAME resident patch tile @ we + be (the 1x1/stride shortcut),
    plus masked per-tile partial batch statistics for both outputs."""
    i = pl.program_id(0)
    p = p_ref[...]                                           # (tm, 9*Cin) bf16
    y1 = jnp.dot(p, w1_ref[...],
                 preferred_element_type=jnp.float32) + b1_ref[...]
    pc = p[:, center_col:center_col + cin]                   # center 1x1 tap
    ye = jnp.dot(pc, we_ref[...],
                 preferred_element_type=jnp.float32) + be_ref[...]
    y1_ref[...] = y1
    ye_ref[...] = ye

    # Mask rows past the true M (ragged last tile) out of the statistics.
    tm = y1.shape[0]
    row = i * tm + lax.broadcasted_iota(jnp.int32, (tm, 1), 0)
    valid = row < m_valid
    y1v = jnp.where(valid, y1, 0.0)
    yev = jnp.where(valid, ye, 0.0)
    s1_ref[...] = jnp.sum(y1v, axis=0, keepdims=True)[None]
    q1_ref[...] = jnp.sum(y1v * y1v, axis=0, keepdims=True)[None]
    se_ref[...] = jnp.sum(yev, axis=0, keepdims=True)[None]
    qe_ref[...] = jnp.sum(yev * yev, axis=0, keepdims=True)[None]


def _conv_stats_kernel(p_ref, w_ref, b_ref, y_ref, s_ref, q_ref, *, m_valid):
    """One M-tile of y = patches @ w + b with masked per-tile partial stats."""
    i = pl.program_id(0)
    y = jnp.dot(p_ref[...], w_ref[...],
                preferred_element_type=jnp.float32) + b_ref[...]
    y_ref[...] = y
    tm = y.shape[0]
    row = i * tm + lax.broadcasted_iota(jnp.int32, (tm, 1), 0)
    yv = jnp.where(row < m_valid, y, 0.0)
    s_ref[...] = jnp.sum(yv, axis=0, keepdims=True)[None]
    q_ref[...] = jnp.sum(yv * yv, axis=0, keepdims=True)[None]


def _bn_relu_kernel(y_ref, s_ref, t_ref, o_ref):
    o_ref[...] = jnp.maximum(y_ref[...] * s_ref[...] + t_ref[...], 0.0)


def _bn_add_bn_relu_kernel(a_ref, b_ref, sa_ref, ta_ref, sb_ref, tb_ref, o_ref):
    o_ref[...] = jnp.maximum(
        a_ref[...] * sa_ref[...] + ta_ref[...]
        + b_ref[...] * sb_ref[...] + tb_ref[...], 0.0)


# -------------------- pallas_call wrappers --------------------

def _finalize_stats(s_part, q_part, m):
    s = jnp.sum(s_part, axis=0)                  # (1, C)
    q = jnp.sum(q_part, axis=0)
    mean = s / m
    var = jnp.maximum(q / m - mean * mean, 0.0)  # clamp single-pass variance
    return mean, var


def conv1_shortcut_with_stats(patches, w1, we, b1, be):
    """patches (M, 9*Cin) bf16 -> (y1 (M,C), ye (M,C), (mean1,var1), (meane,vare))."""
    M, K = patches.shape
    C = w1.shape[1]
    cin = we.shape[0]
    center_col = (K // cin // 2) * cin           # center tap of the 3x3 window

    bytes_per_row = 2 * (K * 2) + 2 * 2 * (C * 4)        # bf16 patches + two f32 outs, dbl-buf
    fixed = 2 * 2 * (K * C + cin * C) + 4 * C * 4        # weights (dbl-buf) + biases
    tm = _pick_tile_m(M, bytes_per_row, fixed)
    G = pl.cdiv(M, tm)

    y1, ye, s1, q1, se, qe = pl.pallas_call(
        functools.partial(_conv1_shortcut_stats_kernel, m_valid=M, cin=cin,
                          center_col=center_col),
        out_shape=(jax.ShapeDtypeStruct((M, C), jnp.float32),
                   jax.ShapeDtypeStruct((M, C), jnp.float32),
                   jax.ShapeDtypeStruct((G, 1, C), jnp.float32),
                   jax.ShapeDtypeStruct((G, 1, C), jnp.float32),
                   jax.ShapeDtypeStruct((G, 1, C), jnp.float32),
                   jax.ShapeDtypeStruct((G, 1, C), jnp.float32)),
        grid=(G,),
        in_specs=[
            pl.BlockSpec((tm, K), lambda i: (i, 0)),
            pl.BlockSpec((K, C), lambda i: (0, 0)),
            pl.BlockSpec((cin, C), lambda i: (0, 0)),
            pl.BlockSpec((1, C), lambda i: (0, 0)),
            pl.BlockSpec((1, C), lambda i: (0, 0)),
        ],
        out_specs=(pl.BlockSpec((tm, C), lambda i: (i, 0)),
                   pl.BlockSpec((tm, C), lambda i: (i, 0)),
                   pl.BlockSpec((1, 1, C), lambda i: (i, 0, 0)),
                   pl.BlockSpec((1, 1, C), lambda i: (i, 0, 0)),
                   pl.BlockSpec((1, 1, C), lambda i: (i, 0, 0)),
                   pl.BlockSpec((1, 1, C), lambda i: (i, 0, 0))),
        compiler_params=_compiler_params(("parallel",)),
    )(patches, w1, we, b1.reshape(1, C).astype(jnp.float32),
      be.reshape(1, C).astype(jnp.float32))
    return y1, ye, _finalize_stats(s1, q1, M), _finalize_stats(se, qe, M)


def conv_with_stats(patches, w, b):
    """patches (M, K) bf16 @ w (K, C) bf16 + b -> (y (M,C) f32, (mean, var))."""
    M, K = patches.shape
    C = w.shape[1]
    bytes_per_row = 2 * (K * 2) + 2 * (C * 4)
    fixed = 2 * 2 * (K * C) + 2 * C * 4
    tm = _pick_tile_m(M, bytes_per_row, fixed)
    G = pl.cdiv(M, tm)

    y, s, q = pl.pallas_call(
        functools.partial(_conv_stats_kernel, m_valid=M),
        out_shape=(jax.ShapeDtypeStruct((M, C), jnp.float32),
                   jax.ShapeDtypeStruct((G, 1, C), jnp.float32),
                   jax.ShapeDtypeStruct((G, 1, C), jnp.float32)),
        grid=(G,),
        in_specs=[pl.BlockSpec((tm, K), lambda i: (i, 0)),
                  pl.BlockSpec((K, C), lambda i: (0, 0)),
                  pl.BlockSpec((1, C), lambda i: (0, 0))],
        out_specs=(pl.BlockSpec((tm, C), lambda i: (i, 0)),
                   pl.BlockSpec((1, 1, C), lambda i: (i, 0, 0)),
                   pl.BlockSpec((1, 1, C), lambda i: (i, 0, 0))),
        compiler_params=_compiler_params(("parallel",)),
    )(patches, w, b.reshape(1, C).astype(jnp.float32))
    return y, _finalize_stats(s, q, M)


def bn_relu(y, scale, shift):
    """relu(y * scale + shift), lane-dense-folded when C < 128."""
    M, C = y.shape
    k = _lane_fold(M, C)
    yv = y.reshape(M // k, k * C)                 # row-major: free relayout
    sv = jnp.tile(scale, (1, k))
    tv = jnp.tile(shift, (1, k))
    Md, Cd = yv.shape
    tm = _pick_tile_m(Md, 2 * 2 * Cd * 4)
    out = pl.pallas_call(
        _bn_relu_kernel,
        out_shape=jax.ShapeDtypeStruct((Md, Cd), jnp.float32),
        grid=(pl.cdiv(Md, tm),),
        in_specs=[pl.BlockSpec((tm, Cd), lambda i: (i, 0)),
                  pl.BlockSpec((1, Cd), lambda i: (0, 0)),
                  pl.BlockSpec((1, Cd), lambda i: (0, 0))],
        out_specs=pl.BlockSpec((tm, Cd), lambda i: (i, 0)),
        compiler_params=_compiler_params(("parallel",)),
    )(yv, sv, tv)
    return out.reshape(M, C)


def residual_bn_add_relu(y2, ye, s2, t2, se, te):
    """relu( bn2(y2) + bn_extra(ye) ), lane-dense-folded."""
    M, C = y2.shape
    k = _lane_fold(M, C)
    a = y2.reshape(M // k, k * C)
    b = ye.reshape(M // k, k * C)
    s2v, t2v = jnp.tile(s2, (1, k)), jnp.tile(t2, (1, k))
    sev, tev = jnp.tile(se, (1, k)), jnp.tile(te, (1, k))
    Md, Cd = a.shape
    tm = _pick_tile_m(Md, 3 * 2 * Cd * 4)
    out = pl.pallas_call(
        _bn_add_bn_relu_kernel,
        out_shape=jax.ShapeDtypeStruct((Md, Cd), jnp.float32),
        grid=(pl.cdiv(Md, tm),),
        in_specs=[pl.BlockSpec((tm, Cd), lambda i: (i, 0)),
                  pl.BlockSpec((tm, Cd), lambda i: (i, 0)),
                  pl.BlockSpec((1, Cd), lambda i: (0, 0)),
                  pl.BlockSpec((1, Cd), lambda i: (0, 0)),
                  pl.BlockSpec((1, Cd), lambda i: (0, 0)),
                  pl.BlockSpec((1, Cd), lambda i: (0, 0))],
        out_specs=pl.BlockSpec((tm, Cd), lambda i: (i, 0)),
        compiler_params=_compiler_params(("parallel",)),
    )(a, b, s2v, t2v, sev, tev)
    return out.reshape(M, C)


# -------------------- JAX glue (layout / patch extraction) --------------------

def im2col(x, kh, kw, stride, pad):
    """x: (N, H, W, C) -> patches (N*Ho*Wo, kh*kw*C), plus (Ho, Wo)."""
    N, H, W, C = x.shape
    Ho = (H + 2 * pad - kh) // stride + 1
    Wo = (W + 2 * pad - kw) // stride + 1
    xp = jnp.pad(x, ((0, 0), (pad, pad), (pad, pad), (0, 0)))
    cols = []
    for i in range(kh):
        for j in range(kw):
            cols.append(xp[:, i:i + Ho * stride:stride,
                            j:j + Wo * stride:stride, :])
    patches = jnp.concatenate(cols, axis=-1)  # (N, Ho, Wo, kh*kw*C)
    return patches.reshape(N * Ho * Wo, kh * kw * C), Ho, Wo


def oihw_to_matmul(w):
    """PyTorch conv weight (Cout, Cin, kh, kw) -> (kh*kw*Cin, Cout)."""
    cout, cin, kh, kw = w.shape
    return jnp.transpose(w, (2, 3, 1, 0)).reshape(kh * kw * cin, cout)


def _bn_scale_shift(mean, var, gamma, beta):
    """Precompute per-channel scale/shift once (one rsqrt per channel)."""
    scale = gamma.reshape(1, -1) * lax.rsqrt(var + BN_EPS)
    shift = beta.reshape(1, -1) - mean * scale
    return scale, shift


def down_block_forward(x_nchw, p, stride):
    s0, s1 = stride
    x = jnp.transpose(x_nchw, (0, 2, 3, 1)).astype(jnp.bfloat16)  # NHWC, bf16 MXU operands
    N, H, W, Cin = x.shape
    Cout = p["w1"].shape[0]

    # ---- conv1 (3x3, s0, pad1) + shortcut conv (1x1, s0) in ONE kernel ----
    p1, H1, W1 = im2col(x, 3, 3, s0, 1)
    w1 = oihw_to_matmul(p["w1"]).astype(jnp.bfloat16)               # (9*Cin, Cout)
    we = jnp.transpose(p["we"][:, :, 0, 0], (1, 0)).astype(jnp.bfloat16)  # (Cin, Cout)
    y1, ye, (m1, v1), (me, ve) = conv1_shortcut_with_stats(p1, w1, we, p["b1"], p["be"])

    sc1, sh1 = _bn_scale_shift(m1, v1, p["g1"], p["beta1"])
    sce, she = _bn_scale_shift(me, ve, p["ge"], p["betae"])

    # ---- bn1 + relu -> a1, then conv2 (3x3, s1, pad1) + fused stats ----
    a1 = bn_relu(y1, sc1, sh1).reshape(N, H1, W1, Cout)
    p2, H2, W2 = im2col(a1.astype(jnp.bfloat16), 3, 3, s1, 1)
    w2 = oihw_to_matmul(p["w2"]).astype(jnp.bfloat16)
    y2, (m2, v2) = conv_with_stats(p2, w2, p["b2"])
    sc2, sh2 = _bn_scale_shift(m2, v2, p["g2"], p["beta2"])

    # ---- relu( bn2(y2) + bn_extra(ye) ) ----
    assert (H2, W2) == (H1, W1), "residual add requires matching branch shapes"
    out = residual_bn_add_relu(y2, ye, sc2, sh2, sce, she)
    out = out.reshape(N, H2, W2, Cout)
    return jnp.transpose(out, (0, 3, 1, 2))  # back to NCHW


# -------------------- pure-JAX reference (for correctness check) ------------

def reference_forward(x, p, stride):
    def conv(x, w, b, s, pad):
        y = lax.conv_general_dilated(
            x, w, window_strides=(s, s), padding=[(pad, pad), (pad, pad)],
            dimension_numbers=("NCHW", "OIHW", "NCHW"))
        return y + b.reshape(1, -1, 1, 1)

    def bn(y, g, b):
        mean = jnp.mean(y, axis=(0, 2, 3), keepdims=True)
        var = jnp.var(y, axis=(0, 2, 3), keepdims=True)  # biased, like PyTorch
        return ((y - mean) * lax.rsqrt(var + BN_EPS) * g.reshape(1, -1, 1, 1)
                + b.reshape(1, -1, 1, 1))

    s0, s1 = stride
    extra = bn(conv(x, p["we"], p["be"], s0, 0), p["ge"], p["betae"])
    out = jax.nn.relu(bn(conv(x, p["w1"], p["b1"], s0, 1), p["g1"], p["beta1"]))
    out = bn(conv(out, p["w2"], p["b2"], s1, 1), p["g2"], p["beta2"])
    return jax.nn.relu(extra + out)


if __name__ == "__main__":
    key = jax.random.PRNGKey(0)
    ks = jax.random.split(key, 12)
    in_c, out_c = 4, 8
    stride = (2, 1)  # classic ResNet-18 downsampling block

    x = jax.random.normal(ks[0], (2, in_c, 16, 16), jnp.float32)
    params = {
        "w1": 0.1 * jax.random.normal(ks[1], (out_c, in_c, 3, 3), jnp.float32),
        "b1": 0.1 * jax.random.normal(ks[2], (out_c,), jnp.float32),
        "g1": 1.0 + 0.1 * jax.random.normal(ks[3], (out_c,), jnp.float32),
        "beta1": 0.1 * jax.random.normal(ks[4], (out_c,), jnp.float32),
        "w2": 0.1 * jax.random.normal(ks[5], (out_c, out_c, 3, 3), jnp.float32),
        "b2": 0.1 * jax.random.normal(ks[6], (out_c,), jnp.float32),
        "g2": 1.0 + 0.1 * jax.random.normal(ks[7], (out_c,), jnp.float32),
        "beta2": 0.1 * jax.random.normal(ks[8], (out_c,), jnp.float32),
        "we": 0.1 * jax.random.normal(ks[9], (out_c, in_c, 1, 1), jnp.float32),
        "be": 0.1 * jax.random.normal(ks[10], (out_c,), jnp.float32),
        "ge": 1.0 + 0.05 * jax.random.normal(ks[11], (out_c,), jnp.float32),
        "betae": jnp.zeros((out_c,), jnp.float32),
    }

    out = jax.block_until_ready(down_block_forward(x, params, stride))
    ref = reference_forward(x, params, stride)

    assert out.shape == ref.shape == (2, out_c, 8, 8), (out.shape, ref.shape)
    # Tolerance accounts for bf16 MXU operands (f32 accumulate) vs the f32 reference.
    assert bool(jnp.allclose(out, ref, atol=5e-2, rtol=5e-2)), (
        float(jnp.max(jnp.abs(out - ref))))
    print("KERNEL_OK")
</pallas_src>

<mosaic_0001>
module attributes {stable_mosaic.version = 11 : i64} {
  func.func @_conv1_shortcut_stats_kernel(%arg0: i32, %arg1: memref<128x36xbf16, #tpu.memory_space<vmem>>, %arg2: memref<36x8xbf16, #tpu.memory_space<vmem>>, %arg3: memref<4x8xbf16, #tpu.memory_space<vmem>>, %arg4: memref<1x8xf32, #tpu.memory_space<vmem>>, %arg5: memref<1x8xf32, #tpu.memory_space<vmem>>, %arg6: memref<128x8xf32, #tpu.memory_space<vmem>>, %arg7: memref<128x8xf32, #tpu.memory_space<vmem>>, %arg8: memref<1x1x8xf32, #tpu.memory_space<vmem>>, %arg9: memref<1x1x8xf32, #tpu.memory_space<vmem>>, %arg10: memref<1x1x8xf32, #tpu.memory_space<vmem>>, %arg11: memref<1x1x8xf32, #tpu.memory_space<vmem>>) attributes {dimension_semantics = [#tpu.dimension_semantics<parallel>], iteration_bounds = array<i64: 1>, scalar_prefetch = 0 : i64, scratch_operands = 0 : i64, tpu.core_type = #tpu.core_type<tc>, window_params = [{transform_indices = @transform_0, window_bounds = array<i64: 128, 36>}, {pipeline_mode = #tpu.pipeline_mode<synchronous>, transform_indices = @transform_1, window_bounds = array<i64: 36, 8>}, {pipeline_mode = #tpu.pipeline_mode<synchronous>, transform_indices = @transform_2, window_bounds = array<i64: 4, 8>}, {pipeline_mode = #tpu.pipeline_mode<synchronous>, transform_indices = @transform_3, window_bounds = array<i64: 1, 8>}, {pipeline_mode = #tpu.pipeline_mode<synchronous>, transform_indices = @transform_4, window_bounds = array<i64: 1, 8>}, {transform_indices = @transform_5, window_bounds = array<i64: 128, 8>}, {transform_indices = @transform_6, window_bounds = array<i64: 128, 8>}, {transform_indices = @transform_7, window_bounds = array<i64: 1, 1, 8>}, {transform_indices = @transform_8, window_bounds = array<i64: 1, 1, 8>}, {transform_indices = @transform_9, window_bounds = array<i64: 1, 1, 8>}, {transform_indices = @transform_10, window_bounds = array<i64: 1, 1, 8>}]} {
    %c0 = arith.constant 0 : index
    %c0_0 = arith.constant 0 : index
    %0 = vector.load %arg1[%c0, %c0_0] : memref<128x36xbf16, #tpu.memory_space<vmem>>, vector<128x36xbf16>
    %c0_1 = arith.constant 0 : index
    %c0_2 = arith.constant 0 : index
    %1 = vector.load %arg2[%c0_1, %c0_2] : memref<36x8xbf16, #tpu.memory_space<vmem>>, vector<36x8xbf16>
    %cst = arith.constant dense<0.000000e+00> : vector<128x8xf32>
    %2 = tpu.matmul %0, %1, %cst {dimension_numbers = #tpu.dot_dimension_numbers<[1], [0], [0], [1], [0, 0, 1, 1], [], []>} : vector<128x36xbf16>, vector<36x8xbf16>, vector<128x8xf32> -> vector<128x8xf32>
    %c0_3 = arith.constant 0 : index
    %c0_4 = arith.constant 0 : index
    %3 = vector.load %arg4[%c0_3, %c0_4] : memref<1x8xf32, #tpu.memory_space<vmem>>, vector<1x8xf32>
    %4 = vector.broadcast %3 : vector<1x8xf32> to vector<128x8xf32>
    %5 = arith.addf %2, %4 : vector<128x8xf32>
    %6 = vector.extract_strided_slice %0 {offsets = [0, 16], sizes = [128, 4], strides = [1, 1]} : vector<128x36xbf16> to vector<128x4xbf16>
    %c0_5 = arith.constant 0 : index
    %c0_6 = arith.constant 0 : index
    %7 = vector.load %arg3[%c0_5, %c0_6] : memref<4x8xbf16, #tpu.memory_space<vmem>>, vector<4x8xbf16>
    %cst_7 = arith.constant dense<0.000000e+00> : vector<128x8xf32>
    %8 = tpu.matmul %6, %7, %cst_7 {dimension_numbers = #tpu.dot_dimension_numbers<[1], [0], [0], [1], [0, 0, 1, 1], [], []>} : vector<128x4xbf16>, vector<4x8xbf16>, vector<128x8xf32> -> vector<128x8xf32>
    %c0_8 = arith.constant 0 : index
    %c0_9 = arith.constant 0 : index
    %9 = vector.load %arg5[%c0_8, %c0_9] : memref<1x8xf32, #tpu.memory_space<vmem>>, vector<1x8xf32>
    %10 = vector.broadcast %9 : vector<1x8xf32> to vector<128x8xf32>
    %11 = arith.addf %8, %10 : vector<128x8xf32>
    %c0_10 = arith.constant 0 : index
    %c0_11 = arith.constant 0 : index
    %12 = vector.load %arg6[%c0_10, %c0_11] : memref<128x8xf32, #tpu.memory_space<vmem>>, vector<128x8xf32>
    tpu.vector_store %arg6[%c0_10, %c0_11], %5 {strides = array<i32>} : memref<128x8xf32, #tpu.memory_space<vmem>>, vector<128x8xf32>,
    %c0_12 = arith.constant 0 : index
    %c0_13 = arith.constant 0 : index
    %13 = vector.load %arg7[%c0_12, %c0_13] : memref<128x8xf32, #tpu.memory_space<vmem>>, vector<128x8xf32>
    tpu.vector_store %arg7[%c0_12, %c0_13], %11 {strides = array<i32>} : memref<128x8xf32, #tpu.memory_space<vmem>>, vector<128x8xf32>,
    %c128_i32 = arith.constant 128 : i32
    %14 = arith.muli %arg0, %c128_i32 : i32
    %15 = tpu.iota {dimensions = array<i32: 0>} : vector<128x1xi32>
    %16 = vector.broadcast %14 : i32 to vector<128x1xi32>
    %17 = arith.addi %16, %15 : vector<128x1xi32>
    %c128_i32_14 = arith.constant 128 : i32
    %18 = vector.broadcast %c128_i32_14 : i32 to vector<128x1xi32>
    %19 = arith.cmpi slt, %17, %18 : vector<128x1xi32>
    %cst_15 = arith.constant 0.000000e+00 : f32
    %20 = vector.shape_cast %19 : vector<128x1xi1> to vector<128x1xi1>
    %21 = vector.broadcast %20 : vector<128x1xi1> to vector<128x8xi1>
    %22 = vector.broadcast %cst_15 : f32 to vector<128x8xf32>
    %23 = arith.select %21, %5, %22 : vector<128x8xi1>, vector<128x8xf32>
    %cst_16 = arith.constant 0.000000e+00 : f32
    %24 = vector.shape_cast %19 : vector<128x1xi1> to vector<128x1xi1>
    %25 = vector.broadcast %24 : vector<128x1xi1> to vector<128x8xi1>
    %26 = vector.broadcast %cst_16 : f32 to vector<128x8xf32>
    %27 = arith.select %25, %11, %26 : vector<128x8xi1>, vector<128x8xf32>
    %cst_17 = arith.constant dense<0.000000e+00> : vector<8xf32>
    %28 = vector.multi_reduction <add>, %23, %cst_17 [0] : vector<128x8xf32> to vector<8xf32>
    %29 = vector.shape_cast %28 : vector<8xf32> to vector<1x8xf32>
    %30 = vector.shape_cast %29 : vector<1x8xf32> to vector<1x1x8xf32>
    %c0_18 = arith.constant 0 : index
    %c0_19 = arith.constant 0 : index
    %c0_20 = arith.constant 0 : index
    %31 = vector.load %arg8[%c0_18, %c0_19, %c0_20] : memref<1x1x8xf32, #tpu.memory_space<vmem>>, vector<1x1x8xf32>
    tpu.vector_store %arg8[%c0_18, %c0_19, %c0_20], %30 {strides = array<i32>} : memref<1x1x8xf32, #tpu.memory_space<vmem>>, vector<1x1x8xf32>,
    %32 = arith.mulf %23, %23 : vector<128x8xf32>
    %cst_21 = arith.constant dense<0.000000e+00> : vector<8xf32>
    %33 = vector.multi_reduction <add>, %32, %cst_21 [0] : vector<128x8xf32> to vector<8xf32>
    %34 = vector.shape_cast %33 : vector<8xf32> to vector<1x8xf32>
    %35 = vector.shape_cast %34 : vector<1x8xf32> to vector<1x1x8xf32>
    %c0_22 = arith.constant 0 : index
    %c0_23 = arith.constant 0 : index
    %c0_24 = arith.constant 0 : index
    %36 = vector.load %arg9[%c0_22, %c0_23, %c0_24] : memref<1x1x8xf32, #tpu.memory_space<vmem>>, vector<1x1x8xf32>
    tpu.vector_store %arg9[%c0_22, %c0_23, %c0_24], %35 {strides = array<i32>} : memref<1x1x8xf32, #tpu.memory_space<vmem>>, vector<1x1x8xf32>,
    %cst_25 = arith.constant dense<0.000000e+00> : vector<8xf32>
    %37 = vector.multi_reduction <add>, %27, %cst_25 [0] : vector<128x8xf32> to vector<8xf32>
    %38 = vector.shape_cast %37 : vector<8xf32> to vector<1x8xf32>
    %39 = vector.shape_cast %38 : vector<1x8xf32> to vector<1x1x8xf32>
    %c0_26 = arith.constant 0 : index
    %c0_27 = arith.constant 0 : index
    %c0_28 = arith.constant 0 : index
    %40 = vector.load %arg10[%c0_26, %c0_27, %c0_28] : memref<1x1x8xf32, #tpu.memory_space<vmem>>, vector<1x1x8xf32>
    tpu.vector_store %arg10[%c0_26, %c0_27, %c0_28], %39 {strides = array<i32>} : memref<1x1x8xf32, #tpu.memory_space<vmem>>, vector<1x1x8xf32>,
    %41 = arith.mulf %27, %27 : vector<128x8xf32>
    %cst_29 = arith.constant dense<0.000000e+00> : vector<8xf32>
    %42 = vector.multi_reduction <add>, %41, %cst_29 [0] : vector<128x8xf32> to vector<8xf32>
    %43 = vector.shape_cast %42 : vector<8xf32> to vector<1x8xf32>
    %44 = vector.shape_cast %43 : vector<1x8xf32> to vector<1x1x8xf32>
    %c0_30 = arith.constant 0 : index
    %c0_31 = arith.constant 0 : index
    %c0_32 = arith.constant 0 : index
    %45 = vector.load %arg11[%c0_30, %c0_31, %c0_32] : memref<1x1x8xf32, #tpu.memory_space<vmem>>, vector<1x1x8xf32>
    tpu.vector_store %arg11[%c0_30, %c0_31, %c0_32], %44 {strides = array<i32>} : memref<1x1x8xf32, #tpu.memory_space<vmem>>, vector<1x1x8xf32>,
    return
  }
  func.func @transform_0(%arg0: i32) -> (i32, i32) {
    %c0_i32 = arith.constant 0 : i32
    %c0_i32_0 = arith.constant 0 : i32
    return %arg0, %c0_i32 : i32, i32
  }
  func.func @transform_1(%arg0: i32) -> (i32, i32) {
    %c0_i32 = arith.constant 0 : i32
    %c0_i32_0 = arith.constant 0 : i32
    %c0_i32_1 = arith.constant 0 : i32
    return %c0_i32, %c0_i32_0 : i32, i32
  }
  func.func @transform_2(%arg0: i32) -> (i32, i32) {
    %c0_i32 = arith.constant 0 : i32
    %c0_i32_0 = arith.constant 0 : i32
    %c0_i32_1 = arith.constant 0 : i32
    return %c0_i32, %c0_i32_0 : i32, i32
  }
  func.func @transform_3(%arg0: i32) -> (i32, i32) {
    %c0_i32 = arith.constant 0 : i32
    %c0_i32_0 = arith.constant 0 : i32
    %c0_i32_1 = arith.constant 0 : i32
    return %c0_i32, %c0_i32_0 : i32, i32
  }
  func.func @transform_4(%arg0: i32) -> (i32, i32) {
    %c0_i32 = arith.constant 0 : i32
    %c0_i32_0 = arith.constant 0 : i32
    %c0_i32_1 = arith.constant 0 : i32
    return %c0_i32, %c0_i32_0 : i32, i32
  }
  func.func @transform_5(%arg0: i32) -> (i32, i32) {
    %c0_i32 = arith.constant 0 : i32
    %c0_i32_0 = arith.constant 0 : i32
    return %arg0, %c0_i32 : i32, i32
  }
  func.func @transform_6(%arg0: i32) -> (i32, i32) {
    %c0_i32 = arith.constant 0 : i32
    %c0_i32_0 = arith.constant 0 : i32
    return %arg0, %c0_i32 : i32, i32
  }
  func.func @transform_7(%arg0: i32) -> (i32, i32, i32) {
    %c0_i32 = arith.constant 0 : i32
    %c0_i32_0 = arith.constant 0 : i32
    %c0_i32_1 = arith.constant 0 : i32
    return %arg0, %c0_i32, %c0_i32_0 : i32, i32, i32
  }
  func.func @transform_8(%arg0: i32) -> (i32, i32, i32) {
    %c0_i32 = arith.constant 0 : i32
    %c0_i32_0 = arith.constant 0 : i32
    %c0_i32_1 = arith.constant 0 : i32
    return %arg0, %c0_i32, %c0_i32_0 : i32, i32, i32
  }
  func.func @transform_9(%arg0: i32) -> (i32, i32, i32) {
    %c0_i32 = arith.constant 0 : i32
    %c0_i32_0 = arith.constant 0 : i32
    %c0_i32_1 = arith.constant 0 : i32
    return %arg0, %c0_i32, %c0_i32_0 : i32, i32, i32
  }
  func.func @transform_10(%arg0: i32) -> (i32, i32, i32) {
    %c0_i32 = arith.constant 0 : i32
    %c0_i32_0 = arith.constant 0 : i32
    %c0_i32_1 = arith.constant 0 : i32
    return %arg0, %c0_i32, %c0_i32_0 : i32, i32, i32
  }
}

</mosaic_0001>

<bundles_post_ra>
// kernel: tpu_custom_call.1
= control target key start
LH: loop header
LB: loop body
LE: loop exit
PB: predicated region body
PF: predicated region fallthrough
CT: control target
= control target key end

     0   :  { %16 = vsyncpa [#allocation3], 0  ;;  %s1339_s0 = inlined_call_operand.vmem [shape: bf16[128,36], index: 0, kind: input, shape index: {}]   ;;  %s1340_s1 = inlined_call_operand.vmem [shape: bf16[36,8], index: 1, kind: input, shape index: {}]   ;;  %s1341_s2 = inlined_call_operand.vmem [shape: bf16[4,8], index: 2, kind: input, shape index: {}]   ;;  %s1342_s3 = inlined_call_operand.vmem [shape: f32[1,8], index: 3, kind: input, shape index: {}]   ;;  %s1343_s4 = inlined_call_operand.vmem [shape: f32[1,8], index: 4, kind: input, shape index: {}]   ;;  %s1344_s5 = inlined_call_operand.vmem [shape: f32[128,8], index: 5, kind: output, shape index: {0}]   ;;  %s1345_s6 = inlined_call_operand.vmem [shape: f32[128,8], index: 6, kind: output, shape index: {1}]   ;;  %s1346_s7 = inlined_call_operand.hbm [shape: f32[1,1,8], index: 7, kind: output, shape index: {2}]   ;;  %s1347_s8 = inlined_call_operand.hbm [shape: f32[1,1,8], index: 8, kind: output, shape index: {3}]   ;;  %s1348_s9 = inlined_call_operand.hbm [shape: f32[1,1,8], index: 9, kind: output, shape index: {4}]   ;;  %s1349_s10 = inlined_call_operand.hbm [shape: f32[1,1,8], index: 10, kind: output, shape index: {5}]  }
   0x1   :  { %17 = vsyncpa [#allocation5], 0  ;;  %v880_v0 = vld [vmem:[%s1339_s0] sm:$0xff]   ;;  %v881_v1 = vld [vmem:[%s1339_s0 + $0x8] sm:$0xff]   ;;  %s977_s17 = smov 112   ;;  %vm113_vm0 = vcmask 293888  }
   0x2   :  { %247 = vrot.lane.b32.xlu0 %v880_v0, %s977_s17  ;;  %v882_v2 = vld [vmem:[%s1339_s0 + $0x10] sm:$0xff]   ;;  %839 = vmatprep.mubr.msk.bf16.mxu0 %vm113_vm0, %v880_v0  ;;  %v883_v3 = vld [vmem:[%s1339_s0 + $0x18] sm:$0xff]   ;;  %v884_v4 = vld [vmem:[%s1339_s0 + $0x20] sm:$0xff]   ;;  %vm138_vm1 = vcmask 1041408  }
   0x3   :  { %251 = vrot.lane.b32.xlu1 %v882_v2, %s977_s17  ;;  %v885_v5 = vld [vmem:[%s1339_s0 + $0x28] sm:$0xff]   ;;  %v888_v6 = vld [vmem:[%s1340_s1 + $0x10] ss:$0 sps:$4 sm:$0x33]   ;;  %v239_v10 = vld [vmem:[%s1341_s2] sm:$0x3] }
   0x4   :  { %v889_v7 = vld [vmem:[%s1340_s1 + $0x8] sm:$0xff]   ;;  %v886_v8 = vld [vmem:[%s1339_s0 + $0x30] sm:$0xff]   ;;  %873 = vmatprep.subr.msk.bf16.mxu0 %vm138_vm1, %v888_v6  ;;  %v140_v9 = vsel %vm138_vm1, %v888_v6, 0  ;;  %874 = vmatprep.subr.msk.bf16.mxu1 %vm138_vm1, %v239_v10  ;;  %v289_v11 = vsel %vm138_vm1, %v239_v10, 0 }
   0x5   :  { %834 = vmatpush3.bf16.msra.mxu0 %v140_v9 }
   0x6   :  { %249 = vrot.lane.b32.xlu0 %v881_v1, %s977_s17 }
   0x7   :  { %253 = vrot.lane.b32.xlu1 %v883_v3, %s977_s17 }
   0xa   :  { %255 = vrot.lane.b32.xlu0 %v884_v4, %s977_s17 }
   0xb   :  { %18 = vsyncpa [#allocation8], 0  ;;  %257 = vrot.lane.b32.xlu1 %v885_v5, %s977_s17  ;;  %v887_v12 = vld [vmem:[%s1339_s0 + $0x38] sm:$0xff]   ;;  %835 = vmatprep.subr.bf16.mxu0 %v889_v7  ;;  %v890_v13 = vld [vmem:[%s1340_s1] sm:$0xff]   ;;  %vm263_vm2 = vcmask 31744   ;;  %vm388_vm3 = vcmask 64512  }
   0xc   :  { %856 = vmatpush3.bf16.msra.mxu1 %v289_v11  ;;  %836 = vmatpush3.bf16.msra.mxu0 %v889_v7  ;;  %v1092_v23 = vld [vmem:[%s1342_s3] ss:$0 sm:$0xff]  ;;  %vm573_vm4 = vcmask 57344   ;;  %s979_s25 = smov [#allocation4]  }
   0xd   :  { %837 = vmatprep.subr.bf16.mxu0 %v890_v13  ;;  %s741_s26 = sshll.u32 %s979_s25, 4  ;;  %s742_s26 = int_to_ptr.vmem [resolvable:$true] %s741_s26 }
   0xe   :  { %259 = vrot.lane.b32.xlu0 %v886_v8, %s977_s17 }
   0xf   :  { %261 = vrot.lane.b32.xlu1 %v887_v12, %s977_s17 }
  0x10   :  { %838 = vmatpush3.bf16.msra.mxu0 %v890_v13 }
  0x13   :  { %840 = vmatmul.mubr.msk.bf16.vlgmr.msra.gmra.mxu0 %vm113_vm0, %v881_v1 }
  0x14   :  { %843 = vmatprep.mubr.msk.bf16.mxu0 %vm113_vm0, %v882_v2 }
  0x1b   :  { %844 = vmatmul.mubr.msk.bf16.gmra.mxu0 %vm113_vm0, %v883_v3 }
  0x1c   :  { %847 = vmatprep.mubr.msk.bf16.mxu0 %vm113_vm0, %v884_v4 }
  0x23   :  { %848 = vmatmul.mubr.msk.bf16.gmra.mxu0 %vm113_vm0, %v885_v5 }
  0x24   :  { %851 = vmatprep.mubr.msk.bf16.mxu0 %vm113_vm0, %v886_v8 }
  0x2b   :  { %852 = vmatmul.mubr.msk.bf16.gmra.mxu0 %vm113_vm0, %v887_v12 }
  0x74   :  { %v248_v14 = vpop.permute.xlu0 %247 }
  0x75   :  { %857 = vmatprep.mubr.msk.bf16.mxu1 %vm263_vm2, %v248_v14  ;;  %v252_v15 = vpop.permute.xlu1 %251 }
  0x78   :  { %v250_v16 = vpop.permute.xlu0 %249 }
  0x79   :  { %858 = vmatmul.mubr.msk.bf16.vlgmr.msra.gmra.mxu1 %vm263_vm2, %v250_v16  ;;  %v254_v17 = vpop.permute.xlu1 %253 }
  0x7a   :  { %861 = vmatprep.mubr.msk.bf16.mxu1 %vm263_vm2, %v252_v15 }
  0x7c   :  { %v256_v18 = vpop.permute.xlu0 %255 }
  0x7d   :  { %v258_v19 = vpop.permute.xlu1 %257 }
  0x80   :  { %v260_v20 = vpop.permute.xlu0 %259 }
  0x81   :  { %862 = vmatmul.mubr.msk.bf16.gmra.mxu1 %vm263_vm2, %v254_v17  ;;  %v262_v21 = vpop.permute.xlu1 %261 }
  0x82   :  { %865 = vmatprep.mubr.msk.bf16.mxu1 %vm263_vm2, %v256_v18 }
  0x89   :  { %866 = vmatmul.mubr.msk.bf16.gmra.mxu1 %vm263_vm2, %v258_v19 }
  0x8a   :  { %869 = vmatprep.mubr.msk.bf16.mxu1 %vm263_vm2, %v260_v20 }
  0x91   :  { %870 = vmatmul.mubr.msk.bf16.gmra.mxu1 %vm263_vm2, %v262_v21 }
  0xd3   :  { %v841_v22 = vpop.f32.mrf.mxu0 }
  0xd4   :  { %v185_v24 = vadd.f32 %v841_v22, %v1092_v23 }
  0xd5   :  { %v176_v25 = vpop.f32.mrf.mxu0 }
  0xd6   :  { %391 = vst.msk [vmem:[%s1344_s5 + $0x10] sm:$0xff] %vm388_vm3, %v185_v24  ;;  %v177_v26 = vadd.f32 %v1092_v23, %v176_v25  ;;  %v577_v31 = vmul.f32 %v185_v24, %v185_v24  ;;  %v539_v34 = vsel %vm388_vm3, %v185_v24, 0.0 }
  0xd7   :  { %v842_v27 = vpop.f32.mrf.mxu0 }
  0xd8   :  { %389 = vst.msk [vmem:[%s1344_s5] sm:$0xff] %vm388_vm3, %v177_v26  ;;  %v575_v28 = vmul.f32 %v177_v26, %v177_v26  ;;  %v188_v29 = vadd.f32 %v842_v27, %v1092_v23  ;;  %v536_v32 = vsel %vm388_vm3, %v177_v26, 0.0  ;;  %v594_v43 = vsel %vm388_vm3, %v577_v31, 0.0 }
  0xd9   :  { %v179_v30 = vpop.f32.mrf.mxu0 }
  0xda   :  { %392 = vst.msk [vmem:[%s1344_s5 + $0x18] sm:$0xff] %vm388_vm3, %v188_v29  ;;  %v180_v33 = vadd.f32 %v1092_v23, %v179_v30  ;;  %v591_v35 = vsel %vm388_vm3, %v575_v28, 0.0  ;;  %v578_v37 = vmul.f32 %v188_v29, %v188_v29  ;;  %v541_v44 = vsel %vm388_vm3, %v188_v29, 0.0 }
  0xdb   :  { %v845_v36 = vpop.f32.mrf.mxu0 }
  0xdc   :  { %390 = vst.msk [vmem:[%s1344_s5 + $0x8] sm:$0xff] %vm388_vm3, %v180_v33  ;;  %v537_v38 = vsel %vm388_vm3, %v180_v33, 0.0  ;;  %v576_v39 = vmul.f32 %v180_v33, %v180_v33  ;;  %v201_v40 = vadd.f32 %v845_v36, %v1092_v23  ;;  %v596_v50 = vsel %vm388_vm3, %v578_v37, 0.0 }
  0xdd   :  { %v538_v41 = vadd.f32 %v537_v38, %v536_v32  ;;  %v192_v42 = vpop.f32.mrf.mxu0 }
  0xde   :  { %v592_v45 = vsel %vm388_vm3, %v576_v39, 0.0  ;;  %395 = vst.msk [vmem:[%s1344_s5 + $0x30] sm:$0xff] %vm388_vm3, %v201_v40  ;;  %v193_v46 = vadd.f32 %v1092_v23, %v192_v42  ;;  %v581_v57 = vmul.f32 %v201_v40, %v201_v40  ;;  %v547_v60 = vsel %vm388_vm3, %v201_v40, 0.0 }
  0xdf   :  { %v540_v47 = vadd.f32 %v539_v34, %v538_v41  ;;  %v593_v48 = vadd.f32 %v592_v45, %v591_v35  ;;  %v846_v49 = vpop.f32.mrf.mxu0 }
  0xe0   :  { %393 = vst.msk [vmem:[%s1344_s5 + $0x20] sm:$0xff] %vm388_vm3, %v193_v46  ;;  %v543_v51 = vsel %vm388_vm3, %v193_v46, 0.0  ;;  %v579_v52 = vmul.f32 %v193_v46, %v193_v46  ;;  %v204_v53 = vadd.f32 %v846_v49, %v1092_v23  ;;  %v602_v7 = vsel %vm388_vm3, %v581_v57, 0.0 }
  0xe1   :  { %v595_v54 = vadd.f32 %v594_v43, %v593_v48  ;;  %v542_v55 = vadd.f32 %v541_v44, %v540_v47  ;;  %v195_v56 = vpop.f32.mrf.mxu0 }
  0xe2   :  { %v598_v58 = vsel %vm388_vm3, %v579_v52, 0.0  ;;  %396 = vst.msk [vmem:[%s1344_s5 + $0x38] sm:$0xff] %vm388_vm3, %v204_v53  ;;  %v196_v59 = vadd.f32 %v1092_v23, %v195_v56  ;;  %v582_v0 = vmul.f32 %v204_v53, %v204_v53  ;;  %v549_v8 = vsel %vm388_vm3, %v204_v53, 0.0 }
  0xe3   :  { %v544_v61 = vadd.f32 %v543_v51, %v542_v55  ;;  %v597_v62 = vadd.f32 %v596_v50, %v595_v54  ;;  %v849_v63 = vpop.f32.mrf.mxu0 }
  0xe4   :  { %394 = vst.msk [vmem:[%s1344_s5 + $0x28] sm:$0xff] %vm388_vm3, %v196_v59  ;;  %v545_v1 = vsel %vm388_vm3, %v196_v59, 0.0  ;;  %v580_v2 = vmul.f32 %v196_v59, %v196_v59  ;;  %v217_v3 = vadd.f32 %v849_v63, %v1092_v23  ;;  %v604_v14 = vsel %vm388_vm3, %v582_v0, 0.0 }
  0xe5   :  { %v599_v4 = vadd.f32 %v598_v58, %v597_v62  ;;  %v546_v5 = vadd.f32 %v545_v1, %v544_v61  ;;  %v208_v6 = vpop.f32.mrf.mxu0 }
  0xe6   :  { %v600_v9 = vsel %vm388_vm3, %v580_v2, 0.0  ;;  %399 = vst.msk [vmem:[%s1344_s5 + $0x50] sm:$0xff] %vm388_vm3, %v217_v3  ;;  %v209_v10 = vadd.f32 %v1092_v23, %v208_v6  ;;  %v585_v21 = vmul.f32 %v217_v3, %v217_v3  ;;  %v555_v25 = vsel %vm388_vm3, %v217_v3, 0.0 }
  0xe7   :  { %v548_v11 = vadd.f32 %v547_v60, %v546_v5  ;;  %v601_v12 = vadd.f32 %v600_v9, %v599_v4  ;;  %v850_v13 = vpop.f32.mrf.mxu0 }
  0xe8   :  { %397 = vst.msk [vmem:[%s1344_s5 + $0x40] sm:$0xff] %vm388_vm3, %v209_v10  ;;  %v551_v15 = vsel %vm388_vm3, %v209_v10, 0.0  ;;  %v583_v16 = vmul.f32 %v209_v10, %v209_v10  ;;  %v220_v17 = vadd.f32 %v850_v13, %v1092_v23  ;;  %v610_v36 = vsel %vm388_vm3, %v585_v21, 0.0 }
  0xe9   :  { %v603_v18 = vadd.f32 %v602_v7, %v601_v12  ;;  %v550_v19 = vadd.f32 %v549_v8, %v548_v11  ;;  %v211_v20 = vpop.f32.mrf.mxu0 }
  0xea   :  { %v606_v22 = vsel %vm388_vm3, %v583_v16, 0.0  ;;  %400 = vst.msk [vmem:[%s1344_s5 + $0x58] sm:$0xff] %vm388_vm3, %v220_v17  ;;  %v212_v24 = vadd.f32 %v1092_v23, %v211_v20  ;;  %v586_v29 = vmul.f32 %v220_v17, %v220_v17  ;;  %v557_v37 = vsel %vm388_vm3, %v220_v17, 0.0 }
  0xeb   :  { %v552_v26 = vadd.f32 %v551_v15, %v550_v19  ;;  %v605_v27 = vadd.f32 %v604_v14, %v603_v18  ;;  %v853_v28 = vpop.f32.mrf.mxu0 }
  0xec   :  { %398 = vst.msk [vmem:[%s1344_s5 + $0x48] sm:$0xff] %vm388_vm3, %v212_v24  ;;  %v553_v30 = vsel %vm388_vm3, %v212_v24, 0.0  ;;  %v584_v31 = vmul.f32 %v212_v24, %v212_v24  ;;  %v233_v32 = vadd.f32 %v853_v28, %v1092_v23  ;;  %v612_v43 = vsel %vm388_vm3, %v586_v29, 0.0 }
  0xed   :  { %v607_v33 = vadd.f32 %v606_v22, %v605_v27  ;;  %v554_v34 = vadd.f32 %v553_v30, %v552_v26  ;;  %v224_v35 = vpop.f32.mrf.mxu0 }
  0xee   :  { %v608_v38 = vsel %vm388_vm3, %v584_v31, 0.0  ;;  %403 = vst.msk [vmem:[%s1344_s5 + $0x70] sm:$0xff] %vm388_vm3, %v233_v32  ;;  %v225_v39 = vadd.f32 %v1092_v23, %v224_v35  ;;  %v589_v50 = vmul.f32 %v233_v32, %v233_v32  ;;  %v563_v55 = vsel %vm388_vm3, %v233_v32, 0.0 }
  0xef   :  { %v556_v40 = vadd.f32 %v555_v25, %v554_v34  ;;  %v609_v41 = vadd.f32 %v608_v38, %v607_v33  ;;  %v854_v42 = vpop.f32.mrf.mxu0 }
  0xf0   :  { %401 = vst.msk [vmem:[%s1344_s5 + $0x60] sm:$0xff] %vm388_vm3, %v225_v39  ;;  %v559_v44 = vsel %vm388_vm3, %v225_v39, 0.0  ;;  %v587_v45 = vmul.f32 %v225_v39, %v225_v39  ;;  %v236_v46 = vadd.f32 %v854_v42, %v1092_v23  ;;  %v618_v61 = vsel %vm388_vm3, %v589_v50, 0.0 }
  0xf1   :  { %v611_v47 = vadd.f32 %v610_v36, %v609_v41  ;;  %v558_v48 = vadd.f32 %v557_v37, %v556_v40  ;;  %v227_v49 = vpop.f32.mrf.mxu0 }
  0xf2   :  { %v614_v51 = vsel %vm388_vm3, %v587_v45, 0.0  ;;  %404 = vst.msk [vmem:[%s1344_s5 + $0x78] sm:$0xff] %vm388_vm3, %v236_v46  ;;  %v228_v52 = vadd.f32 %v1092_v23, %v227_v49  ;;  %v590_v56 = vmul.f32 %v236_v46, %v236_v46  ;;  %v565_v62 = vsel %vm388_vm3, %v236_v46, 0.0 }
  0xf3   :  { %v560_v53 = vadd.f32 %v559_v44, %v558_v48  ;;  %v613_v54 = vadd.f32 %v612_v43, %v611_v47 }
  0xf4   :  { %402 = vst.msk [vmem:[%s1344_s5 + $0x68] sm:$0xff] %vm388_vm3, %v228_v52  ;;  %v561_v57 = vsel %vm388_vm3, %v228_v52, 0.0  ;;  %v588_v58 = vmul.f32 %v228_v52, %v228_v52  ;;  %v620_v1 = vsel %vm388_vm3, %v590_v56, 0.0  ;;  %s978_s5 = smov [#allocation2]  }
  0xf5   :  { %v615_v59 = vadd.f32 %v614_v51, %v613_v54  ;;  %v562_v60 = vadd.f32 %v561_v57, %v560_v53  ;;  %s731_s24 = sshll.u32 %s978_s5, 4  ;;  %s732_s24 = int_to_ptr.vmem [resolvable:$true] %s731_s24 }
  0xf6   :  { %v616_v23 = vsel %vm388_vm3, %v588_v58, 0.0  ;;  %s891_s27 = scalar_lea.vmem %s732_s24, 16  ;;  %s895_s28 = scalar_lea.vmem %s732_s24, 32 }
  0xf7   :  { %v564_v63 = vadd.f32 %v563_v55, %v562_v60  ;;  %v617_v0 = vadd.f32 %v616_v23, %v615_v59  ;;  %p892_p0 = scmp.ne.s32.totalorder %s732_s24, %s891_s27  ;;  %p896_p1 = scmp.lt.s32.totalorder %s732_s24, %s732_s24 }
  0xf8   :  { %p897_p2 = scmp.lt.s32.totalorder %s895_s28, %s891_s27 }
  0xf9   :  { %v619_v2 = vadd.f32 %v618_v61, %v617_v0  ;;  %v566_v3 = vadd.f32 %v565_v62, %v564_v63 }
  0xfa   :  { %p898_p3 = por %p897_p2, %p896_p1 }
  0xfb   :  { %v621_v4 = vadd.f32 %v620_v1, %v619_v2  ;;  %v567_v5 = vrot.slane %v566_v3, 4 }
  0xfc   :  { %p899_p4 = pnand %p898_p3, %p892_p0 }
  0xfd   :  { %v622_v6 = vrot.slane %v621_v4, 4  ;;  %v568_v7 = vadd.f32 %v567_v5, %v566_v3 }
  0xff   :  { %v623_v8 = vadd.f32 %v622_v6, %v621_v4  ;;  %v569_v9 = vrot.slane %v568_v7, 2 }
 0x101   :  { %v624_v10 = vrot.slane %v623_v8, 2  ;;  %v570_v11 = vadd.f32 %v569_v9, %v568_v7 }
 0x103   :  { %v625_v12 = vadd.f32 %v624_v10, %v623_v8  ;;  %v571_v13 = vrot.slane %v570_v11, 1 }
 0x105   :  { %v626_v14 = vrot.slane %v625_v12, 1  ;;  %v572_v15 = vadd.f32 %v571_v13, %v570_v11 }
 0x107   :  { %v627_v16 = vadd.f32 %v626_v14, %v625_v12  ;;  %574 = vst.msk [vmem:[#allocation2] sm:$0x1] %vm573_vm4, %v572_v15 }
 0x108   :  { %902 = shalt.err (!%p899_p4)
}
 0x109   :  { %734 = dma.vmem_to_hbm [thread:$0]  %s732_s24, 16, %s1346_s7, [#allocation3]   ;;  %628 = vst.msk [vmem:[#allocation4] sm:$0x1] %vm573_vm4, %v627_v16 }
 0x10a   :  { %s911_s11 = scalar_lea.vmem %s742_s26, 16  ;;  %s915_s12 = scalar_lea.vmem %s742_s26, 32 }
 0x10b   :  { %p912_p5 = scmp.ne.s32.totalorder %s742_s26, %s911_s11  ;;  %p916_p6 = scmp.lt.s32.totalorder %s742_s26, %s742_s26 }
 0x10c   :  { %p917_p7 = scmp.lt.s32.totalorder %s915_s12, %s911_s11 }
 0x10e   :  { %p918_p8 = por %p917_p7, %p916_p6 }
 0x110   :  { %p919_p9 = pnand %p918_p8, %p912_p5 }
 0x112   :  { %922 = shalt.err (!%p919_p9)
}
 0x113   :  { %744 = dma.vmem_to_hbm [thread:$0]  %s742_s26, 16, %s1347_s8, [#allocation5]   ;;  %v1217_v17 = vld [vmem:[%s1343_s4] ss:$0 sm:$0xff] }
 0x114   :  { %s981_s1 = smov [#allocation7]  }
 0x115   :  { %s761_s2 = sshll.u32 %s981_s1, 4  ;;  %s762_s2 = int_to_ptr.vmem [resolvable:$true] %s761_s2 }
 0x139   :  { %v859_v18 = vpop.f32.mrf.mxu1 }
 0x13a   :  { %v334_v19 = vadd.f32 %v859_v18, %v1217_v17 }
 0x13b   :  { %v325_v20 = vpop.f32.mrf.mxu1 }
 0x13c   :  { %407 = vst.msk [vmem:[%s1345_s6 + $0x10] sm:$0xff] %vm388_vm3, %v334_v19  ;;  %v326_v21 = vadd.f32 %v1217_v17, %v325_v20  ;;  %v669_v28 = vmul.f32 %v334_v19, %v334_v19  ;;  %v632_v34 = vsel %vm388_vm3, %v334_v19, 0.0 }
 0x13d   :  { %v860_v22 = vpop.f32.mrf.mxu1 }
 0x13e   :  { %405 = vst.msk [vmem:[%s1345_s6] sm:$0xff] %vm388_vm3, %v326_v21  ;;  %v337_v24 = vadd.f32 %v860_v22, %v1217_v17  ;;  %v667_v26 = vmul.f32 %v326_v21, %v326_v21  ;;  %v629_v30 = vsel %vm388_vm3, %v326_v21, 0.0  ;;  %v686_v44 = vsel %vm388_vm3, %v669_v28, 0.0 }
 0x13f   :  { %v328_v25 = vpop.f32.mrf.mxu1 }
 0x140   :  { %408 = vst.msk [vmem:[%s1345_s6 + $0x18] sm:$0xff] %vm388_vm3, %v337_v24  ;;  %v329_v27 = vadd.f32 %v1217_v17, %v328_v25  ;;  %v683_v37 = vsel %vm388_vm3, %v667_v26, 0.0  ;;  %v670_v38 = vmul.f32 %v337_v24, %v337_v24  ;;  %v634_v45 = vsel %vm388_vm3, %v337_v24, 0.0 }
 0x141   :  { %v863_v29 = vpop.f32.mrf.mxu1 }
 0x142   :  { %406 = vst.msk [vmem:[%s1345_s6 + $0x8] sm:$0xff] %vm388_vm3, %v329_v27  ;;  %v630_v31 = vsel %vm388_vm3, %v329_v27, 0.0  ;;  %v668_v32 = vmul.f32 %v329_v27, %v329_v27  ;;  %v350_v33 = vadd.f32 %v863_v29, %v1217_v17  ;;  %v688_v51 = vsel %vm388_vm3, %v670_v38, 0.0 }
 0x143   :  { %v631_v35 = vadd.f32 %v630_v31, %v629_v30  ;;  %v341_v36 = vpop.f32.mrf.mxu1 }
 0x144   :  { %v684_v39 = vsel %vm388_vm3, %v668_v32, 0.0  ;;  %411 = vst.msk [vmem:[%s1345_s6 + $0x30] sm:$0xff] %vm388_vm3, %v350_v33  ;;  %v342_v40 = vadd.f32 %v1217_v17, %v341_v36  ;;  %v673_v54 = vmul.f32 %v350_v33, %v350_v33  ;;  %v640_v0 = vsel %vm388_vm3, %v350_v33, 0.0 }
 0x145   :  { %v633_v41 = vadd.f32 %v632_v34, %v631_v35  ;;  %v685_v42 = vadd.f32 %v684_v39, %v683_v37  ;;  %v864_v43 = vpop.f32.mrf.mxu1 }
 0x146   :  { %409 = vst.msk [vmem:[%s1345_s6 + $0x20] sm:$0xff] %vm388_vm3, %v342_v40  ;;  %v671_v46 = vmul.f32 %v342_v40, %v342_v40  ;;  %v353_v47 = vadd.f32 %v864_v43, %v1217_v17  ;;  %v636_v52 = vsel %vm388_vm3, %v342_v40, 0.0  ;;  %v694_v7 = vsel %vm388_vm3, %v673_v54, 0.0 }
 0x147   :  { %v687_v48 = vadd.f32 %v686_v44, %v685_v42  ;;  %v635_v49 = vadd.f32 %v634_v45, %v633_v41  ;;  %v344_v50 = vpop.f32.mrf.mxu1 }
 0x148   :  { %412 = vst.msk [vmem:[%s1345_s6 + $0x38] sm:$0xff] %vm388_vm3, %v353_v47  ;;  %v345_v53 = vadd.f32 %v1217_v17, %v344_v50  ;;  %v690_v58 = vsel %vm388_vm3, %v671_v46, 0.0  ;;  %v674_v1 = vmul.f32 %v353_v47, %v353_v47  ;;  %v642_v8 = vsel %vm388_vm3, %v353_v47, 0.0 }
 0x149   :  { %v637_v55 = vadd.f32 %v636_v52, %v635_v49  ;;  %v689_v56 = vadd.f32 %v688_v51, %v687_v48  ;;  %v867_v57 = vpop.f32.mrf.mxu1 }
 0x14a   :  { %410 = vst.msk [vmem:[%s1345_s6 + $0x28] sm:$0xff] %vm388_vm3, %v345_v53  ;;  %v638_v59 = vsel %vm388_vm3, %v345_v53, 0.0  ;;  %v672_v60 = vmul.f32 %v345_v53, %v345_v53  ;;  %v366_v61 = vadd.f32 %v867_v57, %v1217_v17  ;;  %v696_v14 = vsel %vm388_vm3, %v674_v1, 0.0 }
 0x14b   :  { %v691_v62 = vadd.f32 %v690_v58, %v689_v56  ;;  %v639_v23 = vadd.f32 %v638_v59, %v637_v55  ;;  %v357_v63 = vpop.f32.mrf.mxu1 }
 0x14c   :  { %v692_v2 = vsel %vm388_vm3, %v672_v60, 0.0  ;;  %415 = vst.msk [vmem:[%s1345_s6 + $0x50] sm:$0xff] %vm388_vm3, %v366_v61  ;;  %v358_v3 = vadd.f32 %v1217_v17, %v357_v63  ;;  %v677_v18 = vmul.f32 %v366_v61, %v366_v61  ;;  %v648_v30 = vsel %vm388_vm3, %v366_v61, 0.0 }
 0x14d   :  { %v641_v4 = vadd.f32 %v640_v0, %v639_v23  ;;  %v693_v5 = vadd.f32 %v692_v2, %v691_v62  ;;  %v868_v6 = vpop.f32.mrf.mxu1 }
 0x14e   :  { %413 = vst.msk [vmem:[%s1345_s6 + $0x40] sm:$0xff] %vm388_vm3, %v358_v3  ;;  %v675_v9 = vmul.f32 %v358_v3, %v358_v3  ;;  %v369_v10 = vadd.f32 %v868_v6, %v1217_v17  ;;  %v644_v15 = vsel %vm388_vm3, %v358_v3, 0.0  ;;  %v702_v37 = vsel %vm388_vm3, %v677_v18, 0.0 }
 0x14f   :  { %v695_v11 = vadd.f32 %v694_v7, %v693_v5  ;;  %v643_v12 = vadd.f32 %v642_v8, %v641_v4  ;;  %v360_v13 = vpop.f32.mrf.mxu1 }
 0x150   :  { %416 = vst.msk [vmem:[%s1345_s6 + $0x58] sm:$0xff] %vm388_vm3, %v369_v10  ;;  %v361_v16 = vadd.f32 %v1217_v17, %v360_v13  ;;  %v698_v22 = vsel %vm388_vm3, %v675_v9, 0.0  ;;  %v678_v31 = vmul.f32 %v369_v10, %v369_v10  ;;  %v650_v38 = vsel %vm388_vm3, %v369_v10, 0.0 }
 0x151   :  { %v645_v19 = vadd.f32 %v644_v15, %v643_v12  ;;  %v697_v20 = vadd.f32 %v696_v14, %v695_v11  ;;  %v871_v21 = vpop.f32.mrf.mxu1 }
 0x152   :  { %414 = vst.msk [vmem:[%s1345_s6 + $0x48] sm:$0xff] %vm388_vm3, %v361_v16  ;;  %v646_v24 = vsel %vm388_vm3, %v361_v16, 0.0  ;;  %v676_v25 = vmul.f32 %v361_v16, %v361_v16  ;;  %v382_v26 = vadd.f32 %v871_v21, %v1217_v17  ;;  %v704_v44 = vsel %vm388_vm3, %v678_v31, 0.0 }
 0x153   :  { %v699_v27 = vadd.f32 %v698_v22, %v697_v20  ;;  %v647_v28 = vadd.f32 %v646_v24, %v645_v19  ;;  %v373_v29 = vpop.f32.mrf.mxu1 }
 0x154   :  { %v700_v32 = vsel %vm388_vm3, %v676_v25, 0.0  ;;  %419 = vst.msk [vmem:[%s1345_s6 + $0x70] sm:$0xff] %vm388_vm3, %v382_v26  ;;  %v374_v33 = vadd.f32 %v1217_v17, %v373_v29  ;;  %v681_v49 = vmul.f32 %v382_v26, %v382_v26  ;;  %v656_v55 = vsel %vm388_vm3, %v382_v26, 0.0 }
 0x155   :  { %v649_v34 = vadd.f32 %v648_v30, %v647_v28  ;;  %v701_v35 = vadd.f32 %v700_v32, %v699_v27  ;;  %v872_v36 = vpop.f32.mrf.mxu1 }
 0x156   :  { %417 = vst.msk [vmem:[%s1345_s6 + $0x60] sm:$0xff] %vm388_vm3, %v374_v33  ;;  %v679_v39 = vmul.f32 %v374_v33, %v374_v33  ;;  %v385_v40 = vadd.f32 %v872_v36, %v1217_v17  ;;  %v652_v45 = vsel %vm388_vm3, %v374_v33, 0.0  ;;  %v710_v59 = vsel %vm388_vm3, %v681_v49, 0.0 }
 0x157   :  { %v703_v41 = vadd.f32 %v702_v37, %v701_v35  ;;  %v651_v42 = vadd.f32 %v650_v38, %v649_v34  ;;  %v376_v43 = vpop.f32.mrf.mxu1 }
 0x158   :  { %420 = vst.msk [vmem:[%s1345_s6 + $0x78] sm:$0xff] %vm388_vm3, %v385_v40  ;;  %v377_v46 = vadd.f32 %v1217_v17, %v376_v43  ;;  %v706_v50 = vsel %vm388_vm3, %v679_v39, 0.0  ;;  %v682_v56 = vmul.f32 %v385_v40, %v385_v40  ;;  %v658_v60 = vsel %vm388_vm3, %v385_v40, 0.0 }
 0x159   :  { %v653_v47 = vadd.f32 %v652_v45, %v651_v42  ;;  %v705_v48 = vadd.f32 %v704_v44, %v703_v41 }
 0x15a   :  { %418 = vst.msk [vmem:[%s1345_s6 + $0x68] sm:$0xff] %vm388_vm3, %v377_v46  ;;  %v654_v51 = vsel %vm388_vm3, %v377_v46, 0.0  ;;  %v680_v52 = vmul.f32 %v377_v46, %v377_v46  ;;  %v712_v23 = vsel %vm388_vm3, %v682_v56, 0.0  ;;  %s980_s6 = smov [#allocation6]  }
 0x15b   :  { %v707_v53 = vadd.f32 %v706_v50, %v705_v48  ;;  %v655_v54 = vadd.f32 %v654_v51, %v653_v47  ;;  %s751_s4 = sshll.u32 %s980_s6, 4  ;;  %s752_s4 = int_to_ptr.vmem [resolvable:$true] %s751_s4 }
 0x15c   :  { %v708_v17 = vsel %vm388_vm3, %v680_v52, 0.0  ;;  %s931_s17 = scalar_lea.vmem %s752_s4, 16  ;;  %s935_s19 = scalar_lea.vmem %s752_s4, 32 }
 0x15d   :  { %v657_v57 = vadd.f32 %v656_v55, %v655_v54  ;;  %v709_v58 = vadd.f32 %v708_v17, %v707_v53  ;;  %p932_p10 = scmp.ne.s32.totalorder %s752_s4, %s931_s17  ;;  %p936_p11 = scmp.lt.s32.totalorder %s752_s4, %s752_s4 }
 0x15e   :  { %p937_p12 = scmp.lt.s32.totalorder %s935_s19, %s931_s17 }
 0x15f   :  { %v711_v61 = vadd.f32 %v710_v59, %v709_v58  ;;  %v659_v62 = vadd.f32 %v658_v60, %v657_v57 }
 0x160   :  { %p938_p13 = por %p937_p12, %p936_p11 }
 0x161   :  { %v660_v63 = vrot.slane %v659_v62, 4  ;;  %v713_v0 = vadd.f32 %v712_v23, %v711_v61 }
 0x162   :  { %p939_p0 = pnand %p938_p13, %p932_p10 }
 0x163   :  { %v661_v1 = vadd.f32 %v660_v63, %v659_v62  ;;  %v714_v2 = vrot.slane %v713_v0, 4 }
 0x165   :  { %v662_v3 = vrot.slane %v661_v1, 2  ;;  %v715_v4 = vadd.f32 %v714_v2, %v713_v0 }
 0x167   :  { %v663_v5 = vadd.f32 %v662_v3, %v661_v1  ;;  %v716_v6 = vrot.slane %v715_v4, 2 }
 0x169   :  { %v664_v7 = vrot.slane %v663_v5, 1  ;;  %v717_v8 = vadd.f32 %v716_v6, %v715_v4 }
 0x16b   :  { %v665_v9 = vadd.f32 %v664_v7, %v663_v5  ;;  %v718_v10 = vrot.slane %v717_v8, 1 }
 0x16d   :  { %666 = vst.msk [vmem:[#allocation6] sm:$0x1] %vm573_vm4, %v665_v9  ;;  %v719_v11 = vadd.f32 %v718_v10, %v717_v8 }
 0x16e   :  { %942 = shalt.err (!%p939_p0)
}
 0x16f   :  { %754 = dma.vmem_to_hbm [thread:$0]  %s752_s4, 16, %s1348_s9, [#allocation5]   ;;  %720 = vst.msk [vmem:[#allocation7] sm:$0x1] %vm573_vm4, %v719_v11 }
 0x170   :  { %s951_s21 = scalar_lea.vmem %s762_s2, 16  ;;  %s955_s22 = scalar_lea.vmem %s762_s2, 32 }
 0x171   :  { %p952_p1 = scmp.ne.s32.totalorder %s762_s2, %s951_s21  ;;  %p956_p2 = scmp.lt.s32.totalorder %s762_s2, %s762_s2 }
 0x172   :  { %p957_p3 = scmp.lt.s32.totalorder %s955_s22, %s951_s21 }
 0x174   :  { %p958_p4 = por %p957_p3, %p956_p2 }
 0x176   :  { %p959_p5 = pnand %p958_p4, %p952_p1 }
 0x178   :  { %962 = shalt.err (!%p959_p5)
}
 0x179   :  { %764 = dma.vmem_to_hbm [thread:$0]  %s762_s2, 16, %s1349_s10, [#allocation8]  }
 0x17a   :  { %971 = dma.done.wait [#allocation3], 16  }
 0x17b   :  { %972 = vsyncadd [#allocation3], 4294967280 }
 0x17c   :  { %973 = dma.done.wait [#allocation5], 32  }
 0x17d   :  { %974 = vsyncadd [#allocation5], 4294967264 }
 0x17e   :  { %975 = dma.done.wait [#allocation8], 16  }
 0x17f   :  { %976 = vsyncadd [#allocation8], 4294967280 }
 0x180   :  { %781 = vsyncpa [#allocation3], 1 }
 0x181   :  { %782 = vsyncpa [#allocation5], 1 }
 0x182   :  { %783 = vsyncpa [#allocation8], 1 }

</bundles_post_ra>
